<compile_context>
chip_gen: v6e
topology: v6e:2x2x1
jax: 0.10.0
libtpu: 0.0.40
codegen_flags: <defaults>
</compile_context>

<pallas_src>
import functools

import jax
import jax.numpy as jnp
from jax.experimental import pallas as pl
from jax.experimental.pallas import tpu as pltpu


def _se_kernel(x_ref, w1_ref, b1_ref, w2_ref, b2_ref, o_ref, *, inv_hw, use_mxu):
    # x_ref block: (Bt, C, HW) -- Bt batch elements, lane-dense spatial axis.
    x = x_ref[...]

    # ---- squeeze: global average pool (f32 accumulation, true-HW divisor) ----
    y = jnp.sum(x, axis=-1, dtype=jnp.float32) * inv_hw          # (Bt, C)

    w1 = w1_ref[...].astype(jnp.float32)                          # (Cr, C)
    b1 = b1_ref[...].astype(jnp.float32)                          # (1, Cr)
    w2 = w2_ref[...].astype(jnp.float32)                          # (C, Cr)
    b2 = b2_ref[...].astype(jnp.float32)                          # (1, C)

    # ---- excite: fc1 -> relu -> fc2 -> sigmoid, batched over Bt ----
    if use_mxu:
        # Batched matmuls: (Bt, C) x (Cr, C)^T and (Bt, Cr) x (C, Cr)^T.
        h = jax.lax.dot_general(y, w1, (((1,), (1,)), ((), ())),
                                preferred_element_type=jnp.float32) + b1
        h = jnp.maximum(h, 0.0)
        s = jax.lax.dot_general(h, w2, (((1,), (1,)), ((), ())),
                                preferred_element_type=jnp.float32) + b2
    else:
        # Small C/Cr: keep it off the MXU (avoid serialized push/pop latency
        # on the DMA-bound critical path) -- VPU broadcast-multiply + reduce.
        h = jnp.sum(y[:, None, :] * w1[None, :, :], axis=-1) + b1   # (Bt, Cr)
        h = jnp.maximum(h, 0.0)
        s = jnp.sum(h[:, None, :] * w2[None, :, :], axis=-1) + b2   # (Bt, C)
    s = jax.nn.sigmoid(s)

    # ---- scale: broadcast channel gates over spatial, in x's dtype ----
    o_ref[...] = (x * s[:, :, None].astype(x.dtype)).astype(o_ref.dtype)


def _vmem_budget_bytes():
    """~75% of physical VMEM (96 MiB on v5e/v6e, 48 MiB on v7x); safe fallback."""
    try:
        cap = pltpu.get_tpu_info().vmem_capacity_bytes
    except Exception:
        cap = 64 * 1024 * 1024  # conservative (v7x-sized) assumption
    return (cap * 3) // 4


def se_layer(x, w1, b1, w2, b2):
    """x: (B, C, H, W). w1: (Cr, C), b1: (Cr,), w2: (C, Cr), b2: (C,)."""
    B, C, H, W = x.shape
    Cr = w1.shape[0]
    HW = H * W
    itemsize = jnp.dtype(x.dtype).itemsize

    # Free reshape (contiguous): spatial axis becomes the lane-dense last dim.
    x_flat = x.reshape(B, C, HW)

    # --- pick Bt: biggest batch tile whose double-buffered in+out slabs fit ---
    budget = int(_vmem_budget_bytes())
    weight_bytes = 4 * (w1.size + b1.size + w2.size + b2.size)
    slab_bytes = C * HW * itemsize                   # one batch element, in VMEM
    avail = budget - weight_bytes - (2 << 20)        # headroom
    bt = max(1, avail // (4 * slab_bytes))           # 2 bufs x (in + out)
    bt = min(bt, B)
    if B >= 2:
        bt = min(bt, (B + 1) // 2)                   # >=2 grid steps (v7x: 2 TCs)
    nb = pl.cdiv(B, bt)

    use_mxu = (C > 128) or (Cr > 128)
    kernel = functools.partial(_se_kernel, inv_hw=1.0 / HW, use_mxu=use_mxu)

    out_flat = pl.pallas_call(
        kernel,
        out_shape=jax.ShapeDtypeStruct((B, C, HW), x.dtype),
        grid_spec=pltpu.PrefetchScalarGridSpec(
            num_scalar_prefetch=0,
            grid=(nb,),
            in_specs=[
                pl.BlockSpec((bt, C, HW), lambda i: (i, 0, 0)),    # x (batch tile)
                pl.BlockSpec((Cr, C), lambda i: (0, 0)),           # w1 (resident)
                pl.BlockSpec((1, Cr), lambda i: (0, 0)),           # b1
                pl.BlockSpec((C, Cr), lambda i: (0, 0)),           # w2
                pl.BlockSpec((1, C), lambda i: (0, 0)),            # b2
            ],
            out_specs=pl.BlockSpec((bt, C, HW), lambda i: (i, 0, 0)),
        ),
        compiler_params=pltpu.CompilerParams(
            dimension_semantics=("parallel",),
            vmem_limit_bytes=budget,
        ),
    )(x_flat, w1, b1.reshape(1, Cr), w2, b2.reshape(1, C))

    return out_flat.reshape(B, C, H, W)


def _reference(x, w1, b1, w2, b2):
    # Pure-JAX reference of the PyTorch forward.
    y = jnp.mean(x, axis=(2, 3))                   # (B, C)
    h = jnp.maximum(y @ w1.T + b1, 0.0)            # (B, Cr)
    s = jax.nn.sigmoid(h @ w2.T + b2)              # (B, C)
    return x * s[:, :, None, None]


if __name__ == "__main__":
    # Module hyperparameters (small shapes): channel=4, reduction=1.
    B, C, H, W = 2, 4, 16, 16
    reduction = 1
    Cr = C // reduction

    key = jax.random.PRNGKey(0)
    kx, k1, k2, k3, k4 = jax.random.split(key, 5)

    x = jax.random.normal(kx, (B, C, H, W), dtype=jnp.float32)

    # Deterministic synthetic Linear parameters (PyTorch shapes: weight=(out,in)).
    bound1 = 1.0 / (C ** 0.5)
    w1 = jax.random.uniform(k1, (Cr, C), jnp.float32, -bound1, bound1)
    b1 = jax.random.uniform(k2, (Cr,), jnp.float32, -bound1, bound1)
    bound2 = 1.0 / (Cr ** 0.5)
    w2 = jax.random.uniform(k3, (C, Cr), jnp.float32, -bound2, bound2)
    b2 = jax.random.uniform(k4, (C,), jnp.float32, -bound2, bound2)

    out = jax.block_until_ready(se_layer(x, w1, b1, w2, b2))

    ref = _reference(x, w1, b1, w2, b2)
    assert out.shape == (B, C, H, W)
    assert jnp.allclose(out, ref, atol=1e-5, rtol=1e-5), "mismatch vs reference"

    print("KERNEL_OK")
</pallas_src>

<mosaic_0001>
module attributes {stable_mosaic.version = 11 : i64} {
  func.func @_se_kernel(%arg0: i32, %arg1: memref<1x4x256xf32, #tpu.memory_space<vmem>>, %arg2: memref<4x4xf32, #tpu.memory_space<vmem>>, %arg3: memref<1x4xf32, #tpu.memory_space<vmem>>, %arg4: memref<4x4xf32, #tpu.memory_space<vmem>>, %arg5: memref<1x4xf32, #tpu.memory_space<vmem>>, %arg6: memref<1x4x256xf32, #tpu.memory_space<vmem>>) attributes {dimension_semantics = [#tpu.dimension_semantics<parallel>], iteration_bounds = array<i64: 2>, scalar_prefetch = 0 : i64, scratch_operands = 0 : i64, tpu.core_type = #tpu.core_type<tc>, window_params = [{transform_indices = @transform_0, window_bounds = array<i64: 1, 4, 256>}, {pipeline_mode = #tpu.pipeline_mode<synchronous>, transform_indices = @transform_1, window_bounds = array<i64: 4, 4>}, {pipeline_mode = #tpu.pipeline_mode<synchronous>, transform_indices = @transform_2, window_bounds = array<i64: 1, 4>}, {pipeline_mode = #tpu.pipeline_mode<synchronous>, transform_indices = @transform_3, window_bounds = array<i64: 4, 4>}, {pipeline_mode = #tpu.pipeline_mode<synchronous>, transform_indices = @transform_4, window_bounds = array<i64: 1, 4>}, {transform_indices = @transform_5, window_bounds = array<i64: 1, 4, 256>}]} {
    %c0 = arith.constant 0 : index
    %c0_0 = arith.constant 0 : index
    %c0_1 = arith.constant 0 : index
    %0 = vector.load %arg1[%c0, %c0_0, %c0_1] : memref<1x4x256xf32, #tpu.memory_space<vmem>>, vector<1x4x256xf32>
    %cst = arith.constant dense<0.000000e+00> : vector<1x4xf32>
    %1 = vector.multi_reduction <add>, %0, %cst [2] : vector<1x4x256xf32> to vector<1x4xf32>
    %cst_2 = arith.constant 3.906250e-03 : f32
    %2 = vector.broadcast %cst_2 : f32 to vector<1x4xf32>
    %3 = arith.mulf %1, %2 : vector<1x4xf32>
    %c0_3 = arith.constant 0 : index
    %c0_4 = arith.constant 0 : index
    %4 = vector.load %arg2[%c0_3, %c0_4] : memref<4x4xf32, #tpu.memory_space<vmem>>, vector<4x4xf32>
    %c0_5 = arith.constant 0 : index
    %c0_6 = arith.constant 0 : index
    %5 = vector.load %arg3[%c0_5, %c0_6] : memref<1x4xf32, #tpu.memory_space<vmem>>, vector<1x4xf32>
    %c0_7 = arith.constant 0 : index
    %c0_8 = arith.constant 0 : index
    %6 = vector.load %arg4[%c0_7, %c0_8] : memref<4x4xf32, #tpu.memory_space<vmem>>, vector<4x4xf32>
    %c0_9 = arith.constant 0 : index
    %c0_10 = arith.constant 0 : index
    %7 = vector.load %arg5[%c0_9, %c0_10] : memref<1x4xf32, #tpu.memory_space<vmem>>, vector<1x4xf32>
    %8 = vector.shape_cast %3 : vector<1x4xf32> to vector<1x1x4xf32>
    %9 = vector.shape_cast %4 : vector<4x4xf32> to vector<1x4x4xf32>
    %10 = vector.broadcast %8 : vector<1x1x4xf32> to vector<1x4x4xf32>
    %11 = arith.mulf %10, %9 : vector<1x4x4xf32>
    %cst_11 = arith.constant dense<0.000000e+00> : vector<1x4xf32>
    %12 = vector.multi_reduction <add>, %11, %cst_11 [2] : vector<1x4x4xf32> to vector<1x4xf32>
    %13 = arith.addf %12, %5 : vector<1x4xf32>
    %cst_12 = arith.constant 0.000000e+00 : f32
    %14 = vector.broadcast %cst_12 : f32 to vector<1x4xf32>
    %15 = arith.maximumf %13, %14 : vector<1x4xf32>
    %16 = vector.shape_cast %15 : vector<1x4xf32> to vector<1x1x4xf32>
    %17 = vector.shape_cast %6 : vector<4x4xf32> to vector<1x4x4xf32>
    %18 = vector.broadcast %16 : vector<1x1x4xf32> to vector<1x4x4xf32>
    %19 = arith.mulf %18, %17 : vector<1x4x4xf32>
    %cst_13 = arith.constant dense<0.000000e+00> : vector<1x4xf32>
    %20 = vector.multi_reduction <add>, %19, %cst_13 [2] : vector<1x4x4xf32> to vector<1x4xf32>
    %21 = arith.addf %20, %7 : vector<1x4xf32>
    %22 = arith.negf %21 : vector<1x4xf32>
    %23 = math.exp %22 : vector<1x4xf32>
    %cst_14 = arith.constant 1.000000e+00 : f32
    %24 = vector.broadcast %cst_14 : f32 to vector<1x4xf32>
    %25 = arith.addf %24, %23 : vector<1x4xf32>
    %26 = arith.divf %24, %25 : vector<1x4xf32>
    %27 = vector.shape_cast %26 : vector<1x4xf32> to vector<1x4x1xf32>
    %28 = vector.broadcast %27 : vector<1x4x1xf32> to vector<1x4x256xf32>
    %29 = arith.mulf %0, %28 : vector<1x4x256xf32>
    %c0_15 = arith.constant 0 : index
    %c0_16 = arith.constant 0 : index
    %c0_17 = arith.constant 0 : index
    %30 = vector.load %arg6[%c0_15, %c0_16, %c0_17] : memref<1x4x256xf32, #tpu.memory_space<vmem>>, vector<1x4x256xf32>
    tpu.vector_store %arg6[%c0_15, %c0_16, %c0_17], %29 {strides = array<i32>} : memref<1x4x256xf32, #tpu.memory_space<vmem>>, vector<1x4x256xf32>,
    return
  }
  func.func @transform_0(%arg0: i32) -> (i32, i32, i32) {
    %c0_i32 = arith.constant 0 : i32
    %c0_i32_0 = arith.constant 0 : i32
    %c0_i32_1 = arith.constant 0 : i32
    return %arg0, %c0_i32, %c0_i32_0 : i32, i32, i32
  }
  func.func @transform_1(%arg0: i32) -> (i32, i32) {
    %c0_i32 = arith.constant 0 : i32
    %c0_i32_0 = arith.constant 0 : i32
    %c0_i32_1 = arith.constant 0 : i32
    return %c0_i32, %c0_i32_0 : i32, i32
  }
  func.func @transform_2(%arg0: i32) -> (i32, i32) {
    %c0_i32 = arith.constant 0 : i32
    %c0_i32_0 = arith.constant 0 : i32
    %c0_i32_1 = arith.constant 0 : i32
    return %c0_i32, %c0_i32_0 : i32, i32
  }
  func.func @transform_3(%arg0: i32) -> (i32, i32) {
    %c0_i32 = arith.constant 0 : i32
    %c0_i32_0 = arith.constant 0 : i32
    %c0_i32_1 = arith.constant 0 : i32
    return %c0_i32, %c0_i32_0 : i32, i32
  }
  func.func @transform_4(%arg0: i32) -> (i32, i32) {
    %c0_i32 = arith.constant 0 : i32
    %c0_i32_0 = arith.constant 0 : i32
    %c0_i32_1 = arith.constant 0 : i32
    return %c0_i32, %c0_i32_0 : i32, i32
  }
  func.func @transform_5(%arg0: i32) -> (i32, i32, i32) {
    %c0_i32 = arith.constant 0 : i32
    %c0_i32_0 = arith.constant 0 : i32
    %c0_i32_1 = arith.constant 0 : i32
    return %arg0, %c0_i32, %c0_i32_0 : i32, i32, i32
  }
}

</mosaic_0001>

<bundles_post_ra>
// kernel: tpu_custom_call.1
= control target key start
LH: loop header
LB: loop body
LE: loop exit
PB: predicated region body
PF: predicated region fallthrough
CT: control target
= control target key end

     0   :  { %10 = vsyncpa [#allocation3], 0  ;;  %s1010_s0 = inlined_call_operand.hbm [shape: f32[2,4,256], index: 0, kind: input, shape index: {}]   ;;  %s1011_s1 = inlined_call_operand.hbm [shape: f32[4,4], index: 1, kind: input, shape index: {}]   ;;  %s1012_s2 = inlined_call_operand.vmem [shape: f32[1,4], index: 2, kind: input, shape index: {}]   ;;  %s1013_s3 = inlined_call_operand.vmem [shape: f32[4,4], index: 3, kind: input, shape index: {}]   ;;  %s1014_s4 = inlined_call_operand.vmem [shape: f32[1,4], index: 4, kind: input, shape index: {}]   ;;  %s1015_s5 = inlined_call_operand.hbm [shape: f32[2,4,256], index: 5, kind: output, shape index: {}]  }
   0x1   :  { %12 = vsyncpa [#allocation3 + $0x1], 0 }
   0x2   :  { %13 = vsyncpa [#allocation6], 0 }
   0x3   :  { %14 = vsyncpa [#allocation4], 0 }
   0x4   :  { %16 = vsyncpa [#allocation4 + $0x1], 0  ;;  %s809_s18 = smov 0   ;;  %s811_s19 = smov 0  }
   0x5   :  { %s813_s20 = smov 0   ;;  %s815_s21 = smov 0  }
   0x6 LB: > { %s830_s22 = sadd.s32 4294967295, %s772_s21   ;;  %s563_s23 = sadd.s32 4294967294, %s772_s21   ;;  %s772_s21 = sphi %s815_s21, %s1038_s21   ;;  %s768_s20 = sphi %s813_s20, %s1037_s20   ;;  %s764_s19 = sphi %s811_s19, %s1036_s19   ;;  %s760_s18 = sphi %s809_s18, %s1035_s18  }
   0x7   : > { %p42_p0 = scmp.ne.s32.totalorder %s764_s19, %s760_s18  ;;  %p1016_p1 = scmp.eq.s32.totalorder %s830_s22, 0 }
   0x8   : > { %p156_p3 = scmp.eq.s32.totalorder %s563_s23, 1  ;;  %p564_p5 = scmp.ge.s32.totalorder %s772_s21, 1 }
   0x9   : > { %p839_p4 = por %p1016_p1, %p42_p0  ;;  %p163_p7 = scmp.lt.s32.totalorder %s772_s21, 3 }
   0xa   : > { %p844_p6 = por %p156_p3, %p42_p0  ;;  %s774_s27 = smov [#allocation5]  }
   0xb   : > { %s1020_s24 = scalar_select %p839_p4, 1, 0 }
   0xc   : > { %s1021_s25 = scalar_select %p844_p6, 1, 0 }
   0xd   : > { %p849_p8 = pnand %p564_p5, %p163_p7  ;;  %s176_s28 = sshll.u32 %s774_s27, 4  ;;  %s177_s28 = int_to_ptr.vmem [resolvable:$true] %s176_s28 }
   0xe   : > { %s857_s29 = sadd.s32 1, %s772_s21   ;;  %s29_s8 = sadd.s32 1, %s768_s20 }
   0xf   : > { %s1022_s26 = scalar_select %p849_p8, 1, 0 }
  0x10   : > { %p592_p10 = pneg %p849_p8  ;;  %s26_s6 = ssub.s32 %s772_s21, %s857_s29 }
  0x11   : > { %p867_p12 = scmp.eq.s32.totalorder %s26_s6, 0  ;;  %p36_p13 = scmp.ne.s32.totalorder %s768_s20, %s764_s19 }
  0x12   : > { %p861_p11 = pnand %p592_p10, %p1016_p1  ;;  %s661_s9 = scalar_lea.vmem %s177_s28, 64 }
  0x13   : > { %p662_p3 = scmp.ne.s32.totalorder %s177_s28, %s661_s9  ;;  %p669_p9 = scmp.lt.s32.totalorder %s177_s28, %s177_s28 }
  0x14   : > { %p652_p0 = pneg %p861_p11  ;;  %p670_p2 = scmp.lt.s32.totalorder %s661_s9, %s661_s9 }
  0x16   : > { %p664_p5 = pnand %p662_p3, %p652_p0  ;;  %p671_p10 = por %p670_p2, %p669_p9 }
  0x18   : > { %p665_p7 = pneg %p664_p5 }
  0x1a   : > { %p672_p1 = pnand %p671_p10, %p665_p7 }
  0x1c   : > { %675 = shalt.err (!%p672_p1)
}
  0x1d   : > { %595 = dma.hbm_to_vmem [thread:$0]  (!%p861_p11), %s1011_s1, 64, %s177_s28, [#allocation6]  }
  0x1e   : > { %s884_s12 = scalar_select %p867_p12, %s768_s20, %s29_s8  }
  0x1f   : > { %p37_p1 = scmp.eq.s32.totalorder %s772_s21, 0  ;;  %p1025_p2 = scmp.eq.s32.totalorder %s830_s22, 1 }
  0x20   : > { %p605_p0 = scmp.lt.s32.totalorder %s772_s21, 2  ;;  %s196_s14 = sand.u32 1, %s768_s20  }
  0x21   : > { %p892_p9 = por %p1025_p2, %p36_p13  ;;  %p38_p3 = por %p37_p1, %p36_p13 }
  0x22   : > { %s567_s15 = sshll.u32 %s196_s14, 3  ;;  %s582_s16 = sshll.u32 %s772_s21, 7 }
  0x23   : > { %s1026_s13 = scalar_select %p892_p9, 1, 0 }
  0x24   : > { %s905_s27 = scalar_lea.hbm %s1010_s0, %s582_s16  ;;  %s200_s28 = scalar_lea.vmem [#allocation2], %s567_s15 }
  0x25   : > { %s208_s30 = sshll.u32 %s200_s28, 4  ;;  %p907_p11 = pnand %p605_p0, %p38_p3  ;;  %s209_s30 = int_to_ptr.vmem [resolvable:$true] %s208_s30 }
  0x26   : > { %s197_s7 = scalar_lea.sflag [#allocation3], %s196_s14  ;;  %s676_s8 = scalar_lea.hbm %s905_s27, 128 }
  0x27   : > { %p677_p12 = scmp.ne.s32.totalorder %s905_s27, %s676_s8  ;;  %p678_p13 = pneg %p907_p11 }
  0x28   : > { %s681_s11 = scalar_lea.hbm %s1010_s0, 256  ;;  %p682_p10 = scmp.lt.s32.totalorder %s905_s27, %s1010_s0 }
  0x29   : > { %p679_p5 = pnand %p678_p13, %p677_p12  ;;  %p683_p1 = scmp.lt.s32.totalorder %s681_s11, %s676_s8 }
  0x2b   : > { %p680_p7 = pneg %p679_p5  ;;  %p684_p2 = por %p683_p1, %p682_p10 }
  0x2d   : > { %p685_p0 = pnand %p684_p2, %p680_p7 }
  0x2f   : > { %688 = shalt.err (!%p685_p0)
}
  0x30   : > { %s689_s17 = scalar_lea.vmem %s209_s30, 128  ;;  %s775_s14 = smov [#allocation2]  }
  0x31   : > { %p690_p3 = scmp.ne.s32.totalorder %s209_s30, %s689_s17  ;;  %s694_s23 = sshll.u32 %s775_s14, 4  ;;  %s695_s23 = int_to_ptr.vmem [resolvable:$false] %s694_s23 }
  0x32   : > { %s696_s28 = scalar_lea.vmem %s695_s23, 256  ;;  %p697_p12 = scmp.lt.s32.totalorder %s209_s30, %s695_s23 }
  0x33   : > { %p692_p6 = pnand %p690_p3, %p678_p13  ;;  %p698_p5 = scmp.lt.s32.totalorder %s696_s28, %s689_s17 }
  0x35   : > { %p693_p9 = pneg %p692_p6  ;;  %p699_p4 = por %p698_p5, %p697_p12 }
  0x37   : > { %p700_p8 = pnand %p699_p4, %p693_p9 }
  0x39   : > { %703 = shalt.err (!%p700_p8)
}
  0x3a   : > { %599 = dma.hbm_to_vmem [thread:$0]  (!%p907_p11), %s905_s27, 128, %s209_s30, %s197_s7  }
  0x3b   : > { %p1028_p7 = scmp.ne.s32.totalorder %s1022_s26, 0 }
  0x3c   : > { %s928_s8 = sand.u32 (!%p1028_p7), 1, %s764_s19   ;;  %p1029_p4 = scmp.ne.s32.totalorder (!%p1028_p7), %s1020_s24, 0 }
  0x3d   : > { %217 = sbr.rel (%p1028_p7) target bundleno = 958 (0x3be), region = 40  ;;  %s571_s9 = sshll.u32 (!%p1028_p7), %s928_s8, 3 }
  0x3e   : > { %s220_s10 = scalar_lea.sflag (!%p1028_p7), [#allocation3], %s928_s8  ;;  %s223_s11 = scalar_lea.vmem (!%p1028_p7), [#allocation2], %s571_s9 }
  0x42   : > { %747 = dma.done.wait (%p1029_p4), %s220_s10, 128  }
  0x43   : > { %749 = vsyncadd (%p1029_p4), %s220_s10, 4294967168  ;;  %p1030_p6 = scmp.eq.s32.totalorder %s830_s22, 0 }
  0x45   : > { %751 = dma.done.wait (%p1030_p6), [#allocation6], 64   ;;  %p1031_p8 = pmov %p1030_p6 }
  0x46   : > { %v270_v0 = vlaneseq  ;;  %vm258_vm0 = vcmask 1043456   ;;  %v946_v4 = vld [vmem:[%s223_s11] sm:$0xff]  ;;  %v265_v5 = vld [vmem:[#allocation5] sm:$0xf]  ;;  %v776_v15 = vmov 0   ;;  %vm340_vm1 = vcmask 1041409  }
  0x47   : > { %753 = vsyncadd (%p1031_p8), [#allocation6], 4294967232  ;;  %v256_v6 = vcombine.high %v946_v4, %v946_v4  ;;  %v259_v7 = vsel %vm258_vm0, %v946_v4, 0.0  ;;  %643 = vset.pattern.permute.xlu1 %v776_v15  ;;  %644 = vset.pattern.permute.xlu0 %v776_v15  ;;  %v574_v27 = vld [vmem:[%s1012_s2] ss:$0 sm:$0xff]  ;;  %vm342_vm2 = vcmask 1042434  }
  0x48   : > { %v942_v1 = vshrl.u32 %v270_v0, 7  ;;  %v267_v28 = vld [vmem:[%s1013_s3] sm:$0xf]  ;;  %v323_v34 = vand.u32 127, %v270_v0  ;;  %vm344_vm3 = vcmask 1043459   ;;  %vm347_vm4 = vcmask 27648  }
  0x49   : > { %v260_v9 = vsel %vm258_vm0, %v256_v6, 0.0  ;;  %s583_s16 = sshll.u32 %s830_s22, 7  ;;  %s253_s15 = scalar_lea.vmem [#allocation7], %s571_s9 }
  0x4a   : > { %v279_v2 = vsub.s32 1, %v942_v1  ;;  %v286_v3 = vsub.s32 2, %v942_v1  ;;  %v293_v11 = vsub.s32 3, %v942_v1  ;;  %v261_v12 = vadd.f32 %v260_v9, %v259_v7  ;;  %v575_v9 = vld [vmem:[%s1014_s4] ss:$0 sm:$0xff]  ;;  %s483_s17 = sshll.u32 %s253_s15, 4  ;;  %s481_s28 = scalar_lea.hbm %s1015_s5, %s583_s16  ;;  %s484_s17 = int_to_ptr.vmem [resolvable:$true] %s483_s17 }
  0x4b   : > { %v272_v14 = vsub.s32 0, %v942_v1  ;;  %v326_v36 = vsub.s32 %v323_v34, %v942_v1  ;;  %s469_s10 = scalar_lea.sflag [#allocation4], %s928_s8  ;;  %s704_s11 = scalar_lea.vmem %s484_s17, 128 }
  0x4c   : > { %v280_v8 = vrot.slane %v265_v5, %v279_v2  ;;  %v287_v10 = vrot.slane %v265_v5, %v286_v3  ;;  %262 = vadd.xlane.f32.xlu0 %v261_v12  ;;  %v294_v13 = vrot.slane %v265_v5, %v293_v11  ;;  %v373_v30 = vrot.slane %v267_v28, %v279_v2  ;;  %p705_p9 = scmp.ne.s32.totalorder %s484_s17, %s704_s11  ;;  %p1032_p11 = scmp.ne.s32.totalorder %s1026_s13, 0 }
  0x4d   : > { %v273_v16 = vrot.slane %v265_v5, %v272_v14  ;;  %v366_v29 = vrot.slane %v267_v28, %v272_v14  ;;  %v380_v31 = vrot.slane %v267_v28, %v286_v3  ;;  %v387_v32 = vrot.slane %v267_v28, %v293_v11  ;;  %s778_s24 = smov [#allocation7]  }
  0x4e   : > { %282 = vbcast.lane.b32.xlu1 %v280_v8, 256  ;;  %p706_p13 = pnand %p705_p9, %p1032_p11  ;;  %s708_s22 = sshll.u32 %s778_s24, 4  ;;  %s709_s22 = int_to_ptr.vmem [resolvable:$false] %s708_s22 }
  0x4f   : > { %s710_s9 = scalar_lea.vmem %s709_s22, 256  ;;  %p711_p1 = scmp.lt.s32.totalorder %s484_s17, %s709_s22 }
  0x50   : > { %p707_p10 = pneg %p706_p13  ;;  %p712_p2 = scmp.lt.s32.totalorder %s710_s9, %s704_s11 }
  0x52   : > { %289 = vbcast.lane.b32.xlu1 %v287_v10, 256  ;;  %p713_p0 = por %p712_p2, %p711_p1 }
  0x54   : > { %p714_p3 = pnand %p713_p0, %p707_p10 }
  0x56   : > { %296 = vbcast.lane.b32.xlu1 %v294_v13, 256 }
  0x62   : > { %275 = vbcast.lane.b32.xlu0 %v273_v16, 256 }
  0xc0   : > { %v283_v18 = vpop.permute.xlu1 %282 }
  0xc4   : > { %v290_v22 = vpop.permute.xlu1 %289 }
  0xc8   : > { %v297_v25 = vpop.permute.xlu1 %296 }
  0xd5   : > { %v263_v17 = vpop.xlane.xlu0 %262 }
  0xd6   : > { %v264_v19 = vmul.f32 0.00390625, %v263_v17  ;;  %v777_v17 = vmov 839922192  }
  0xd8   : > { %v303_v23 = vmul.f32 %v283_v18, %v264_v19  ;;  %v304_v24 = vmul.f32 %v290_v22, %v264_v19  ;;  %v305_v26 = vmul.f32 %v297_v25, %v264_v19  ;;  %v459_v18 = vunpack.c.l.s4 %v777_v17 }
  0xd9   : > { %v276_v20 = vpop.permute.xlu0 %275 }
  0xda   : > { %v302_v21 = vmul.f32 %v276_v20, %v264_v19  ;;  %v460_v19 = vunpack.c.0.s8 %v459_v18 }
  0xdc   : > { %311 = vperm.xlu1 %643, %v302_v21   ;;  %v463_v20 = vsub.s32 %v460_v19, %v942_v1 }
  0xe0   : > { %314 = vperm.xlu1 %643, %v303_v23  }
  0xe4   : > { %317 = vperm.xlu1 %643, %v304_v24  }
  0xe8   : > { %320 = vperm.xlu1 %643, %v305_v26  }
  0xec   : > { %357 = vbcast.lane.b32.xlu1 %v574_v27, 256 }
  0xf0   : > { %368 = vbcast.lane.b32.xlu1 %v366_v29, 256 }
  0xf4   : > { %375 = vbcast.lane.b32.xlu1 %v373_v30, 256 }
  0xf8   : > { %382 = vbcast.lane.b32.xlu1 %v380_v31, 256 }
  0xfc   : > { %389 = vbcast.lane.b32.xlu1 %v387_v32, 256 }
 0x157   : > { %v312_v33 = vpop.permute.xlu1 %311 }
 0x158   : > { %v327_v40 = vrot.slane %v312_v33, %v326_v36 }
 0x15b   : > { %v315_v35 = vpop.permute.xlu1 %314 }
 0x15c   : > { %v331_v38 = vrot.slane %v315_v35, %v326_v36 }
 0x15e   : > { %v341_v42 = vsel %vm340_vm1, %v331_v38, %v327_v40 }
 0x15f   : > { %v318_v37 = vpop.permute.xlu1 %317 }
 0x160   : > { %v335_v39 = vrot.slane %v318_v37, %v326_v36 }
 0x162   : > { %v343_v44 = vsel %vm342_vm2, %v335_v39, %v341_v42 }
 0x163   : > { %v321_v41 = vpop.permute.xlu1 %320 }
 0x164   : > { %v339_v43 = vrot.slane %v321_v41, %v326_v36 }
 0x166   : > { %v345_v45 = vsel %vm344_vm3, %v339_v43, %v343_v44 }
 0x167   : > { %v348_v46 = vsel %vm347_vm4, %v345_v45, 0.0  ;;  %v358_v47 = vpop.permute.xlu1 %357 }
 0x168   : > { %349 = vadd.xlane.f32.xlu0 %v348_v46 }
 0x16b   : > { %v369_v48 = vpop.permute.xlu1 %368 }
 0x16f   : > { %v376_v49 = vpop.permute.xlu1 %375 }
 0x173   : > { %v383_v50 = vpop.permute.xlu1 %382 }
 0x177   : > { %v390_v53 = vpop.permute.xlu1 %389 }
 0x1f1   : > { %v350_v51 = vpop.xlane.xlu0 %349 }
 0x1f2   : > { %v360_v52 = vadd.f32 %v358_v47, %v350_v51 }
 0x1f4   : > { %v361_v54 = vmax.f32 %v360_v52, 0.0 }
 0x1f6   : > { %v398_v55 = vmul.f32 %v390_v53, %v361_v54  ;;  %v395_v56 = vmul.f32 %v369_v48, %v361_v54  ;;  %v396_v57 = vmul.f32 %v376_v49, %v361_v54  ;;  %v397_v58 = vmul.f32 %v383_v50, %v361_v54 }
 0x1f8   : > { %404 = vperm.xlu1 %643, %v395_v56   ;;  %413 = vperm.xlu0 %644, %v398_v55  }
 0x1fc   : > { %407 = vperm.xlu1 %643, %v396_v57  }
 0x200   : > { %410 = vperm.xlu1 %643, %v397_v58  }
 0x273   : > { %v405_v59 = vpop.permute.xlu1 %404  ;;  %v414_v62 = vpop.permute.xlu0 %413 }
 0x274   : > { %v418_v63 = vrot.slane %v405_v59, %v326_v36  ;;  %v430_v3 = vrot.slane %v414_v62, %v326_v36 }
 0x277   : > { %v408_v60 = vpop.permute.xlu1 %407 }
 0x278   : > { %v422_v61 = vrot.slane %v408_v60, %v326_v36 }
 0x27a   : > { %v431_v5 = vsel %vm340_vm1, %v422_v61, %v418_v63 }
 0x27b   : > { %v411_v0 = vpop.permute.xlu1 %410 }
 0x27c   : > { %v426_v2 = vrot.slane %v411_v0, %v326_v36 }
 0x27e   : > { %v432_v6 = vsel %vm342_vm2, %v426_v2, %v431_v5 }
 0x27f   : > { %v433_v7 = vsel %vm344_vm3, %v430_v3, %v432_v6 }
 0x280   : > { %v435_v8 = vsel %vm347_vm4, %v433_v7, 0.0 }
 0x281   : > { %436 = vadd.xlane.f32.xlu1 %v435_v8 }
 0x292   : > { %444 = vbcast.lane.b32.xlu1 %v575_v9, 256 }
 0x30a   : > { %v437_v10 = vpop.xlane.xlu1 %436 }
 0x30e   : > { %v445_v11 = vpop.permute.xlu1 %444 }
 0x30f   : > { %v447_v12 = vadd.f32 %v445_v11, %v437_v10 }
 0x311   : > { %v576_v13 = vmul.f32 -1.442695, %v447_v12 }
 0x313   : > { %646 = vpow2.f32 %v576_v13 }
 0x320   : > { %v647_v14 = vpop.eup %646 }
 0x321   : > { %v451_v15 = vadd.f32 1.0, %v647_v14 }
 0x323   : > { %648 = vrcp.f32 %v451_v15 }
 0x330   : > { %v649_v16 = vpop.eup %648 }
 0x331   : > { %456 = vperm.xlu0 %644, %v649_v16  }
 0x3ac   : > { %v457_v21 = vpop.permute.xlu0 %456 }
 0x3ad   : > { %v464_v22 = vrot.slane %v457_v21, %v463_v20 }
 0x3af   : > { %v466_v23 = vmul.f32 %v464_v22, %v946_v4 }
 0x3b1   : > { %467 = vst [vmem:[%s253_s15] sm:$0xff] %v466_v23 }
 0x3b2   : > { %717 = shalt.err (!%p714_p3)
}
 0x3b3   : > { %s718_s26 = scalar_lea.hbm %s481_s28, 128  ;;  %s722_s30 = scalar_lea.hbm %s1015_s5, 256 }
 0x3b4   : > { %p719_p12 = scmp.ne.s32.totalorder %s481_s28, %s718_s26  ;;  %p723_p4 = scmp.lt.s32.totalorder %s481_s28, %s1015_s5 }
 0x3b5   : > { %p724_p6 = scmp.lt.s32.totalorder %s722_s30, %s718_s26 }
 0x3b6   : > { %p720_p5 = pnand %p719_p12, %p1032_p11 }
 0x3b7   : > { %p725_p8 = por %p724_p6, %p723_p4 }
 0x3b8   : > { %p721_p7 = pneg %p720_p5 }
 0x3ba   : > { %p726_p9 = pnand %p725_p8, %p721_p7 }
 0x3bc   : > { %729 = shalt.err (!%p726_p9)
}
 0x3bd   : > { %590 = dma.vmem_to_hbm [thread:$0]  (%p1032_p11), %s484_s17, 128, %s481_s28, %s469_s10  }
 0x3be PF: > { %s495_s16 = sand.u32 1, %s760_s18   ;;  %p1033_p13 = scmp.ne.s32.totalorder %s1021_s25, 0 }
 0x3bf   : > { %p1034_p10 = scmp.ge.s32.totalorder %s772_s21, 2  ;;  %s496_s15 = scalar_lea.sflag [#allocation4], %s495_s16 }
 0x3c1   : > { %p601_p1 = pnand %p1034_p10, %p1033_p13 }
 0x3c3   : > { %p602_p2 = pneg %p601_p1 }
 0x3c5   : > { %755 = dma.done.wait (%p602_p2), %s496_s15, 128  }
 0x3c6   : > { %757 = vsyncadd (%p602_p2), %s496_s15, 4294967168  ;;  %p19_p0 = scmp.ge.s32.totalorder %s857_s29, 4   ;;  %s1035_s18 = smov %s764_s19 }
 0x3c7   : > { %s1036_s19 = smov %s768_s20  ;;  %s1037_s20 = smov %s884_s12 }
 0x3c8   : > { %s1038_s21 = smov %s857_s29  ;;  %21 = sbr.rel (!%p19_p0) target bundleno = 6 (0x6), region = 89 }
 0x3cd   :  { %501 = vsyncpa [#allocation3], 1 }
 0x3ce   :  { %503 = vsyncpa [#allocation3 + $0x1], 1 }
 0x3cf   :  { %504 = vsyncpa [#allocation6], 1 }
 0x3d0   :  { %505 = vsyncpa [#allocation4], 1 }
 0x3d1   :  { %507 = vsyncpa [#allocation4 + $0x1], 1 }

</bundles_post_ra>
